<compile_context>
chip_gen: v7x
topology: tpu7x:2x2x1
jax: 0.10.0
libtpu: 0.0.40
codegen_flags: <defaults>
</compile_context>

<pallas_src>
import jax
import jax.numpy as jnp
from jax import lax
from jax.experimental import pallas as pl
from jax.experimental.pallas import tpu as pltpu

MSE_WEIGHT = 0.8
SMOOTH_WEIGHT = 0.1


def _make_loss_kernel(mse_w, mae_w, smooth_w, B, D, TB, T2,
                      use_smooth, needs_mask, mask_start, acc_rows):
    """Builds the kernel body with weights / shapes baked in as static constants."""
    mse_w = float(mse_w)
    mae_w = float(mae_w)
    smooth_w = float(smooth_w)
    inv_n_err = 1.0 / float(B * D)
    inv_n_sm = 1.0 / float((B - 1) * D) if (use_smooth and B > 1) else 0.0

    def kernel(pred_ref, target_ref, out_ref, acc_sq, acc_abs, acc_sm, carry):
        c = pl.program_id(0)           # core (outer, "parallel") axis
        i = pl.program_id(1)           # per-core tile step ("arbitrary") axis
        logical_tile = c * T2 + i

        pred = pred_ref[...].astype(jnp.float32)
        tgt = target_ref[...].astype(jnp.float32)

        @pl.when(i == 0)
        def _init():
            acc_sq[...] = jnp.zeros_like(acc_sq)
            acc_abs[...] = jnp.zeros_like(acc_abs)
            acc_sm[...] = jnp.zeros_like(acc_sm)
            if use_smooth:
                # Seam term is exactly zero on each core's first tile (pred[0]-pred[0]).
                carry[...] = pred[0:1, :]

        def accum(acc_ref, x):
            # x always has TB rows.  (8, D) path: plain vreg-add chain, no XLU reduce.
            if acc_rows == 8:
                if TB == 8:
                    acc_ref[...] += x
                else:
                    acc_ref[...] += x.reshape(TB // 8, 8, D).sum(axis=0)
            else:
                acc_ref[...] += jnp.sum(x, axis=0, keepdims=True)

        def tile_update(masked):
            diff = pred - tgt
            sq = diff * diff
            ab = jnp.abs(diff)
            if masked:
                row_ids = logical_tile * TB + lax.broadcasted_iota(jnp.int32, (TB, 1), 0)
                valid = row_ids < B
                sq = jnp.where(valid, sq, 0.0)
                ab = jnp.where(valid, ab, 0.0)
            accum(acc_sq, sq)
            accum(acc_abs, ab)
            if use_smooth:
                # Row j of d = pred[j] - prev_row[j]; row 0 uses the carried row.
                if TB > 1:
                    prev_rows = jnp.concatenate([carry[...], pred[:-1, :]], axis=0)
                else:
                    prev_rows = carry[...]
                d = pred - prev_rows
                sm = d * d
                if masked:
                    sm = jnp.where(valid, sm, 0.0)
                accum(acc_sm, sm)

        if needs_mask:
            @pl.when(logical_tile < mask_start)
            def _full():
                tile_update(False)

            @pl.when(logical_tile >= mask_start)
            def _ragged():
                tile_update(True)
        else:
            tile_update(False)

        if use_smooth:
            # Carry this tile's last row for the next tile's seam (read happened above).
            carry[...] = pred[TB - 1:TB, :]

        @pl.when(i == pl.num_programs(1) - 1)
        def _finalize():
            # Weights / denominators applied once, here (deferred from the hot loop).
            err = mse_w * jnp.sum(acc_sq[...]) + mae_w * jnp.sum(acc_abs[...])
            total = err * inv_n_err
            if use_smooth:
                total = total + smooth_w * jnp.sum(acc_sm[...]) * inv_n_sm
            out_ref[...] = jnp.full((8, 128), total, jnp.float32)

    return kernel


def _flatten_2d(x):
    if x.ndim == 0:
        return x.reshape(1, 1)
    if x.ndim == 1:
        return x.reshape(x.shape[0], 1)
    return x.reshape(x.shape[0], -1)


def _choose_block_rows(B, D, itemsize, requested):
    if requested is None:
        # ~4 MiB per input tile: 2 inputs x 2 pipeline buffers x 4 MiB = 16 MiB of
        # VMEM for the pipeline (plus small scratch) -- amortizes the ~0.35 us/step
        # overhead even at v7x HBM rates while staying inside every generation's
        # physical VMEM (v7x: 64 MiB) with headroom.  No row cap.
        target_tile_bytes = 4 << 20
        tb = max(8, target_tile_bytes // max(D * itemsize, 1))
    else:
        tb = max(1, int(requested))
    if tb >= B:
        return B                      # single full-array block (no sublane constraint)
    return max(8, (tb // 8) * 8)      # tiled: sublane extent must be a multiple of 8


def combined_loss(pred, target,
                  mse_weight: float = MSE_WEIGHT,
                  smooth_weight: float = SMOOTH_WEIGHT,
                  *, block_rows=None, min_elements_for_pallas: int = 0):
    """Pallas implementation of CombinedLoss.forward. Returns a scalar f32."""
    assert pred.shape == target.shape, (pred.shape, target.shape)
    mae_weight = 1.0 - mse_weight - smooth_weight

    # PyTorch's `pred.dim() > 1 and pred.size(0) > 1` is a static shape check here.
    use_smooth = (pred.ndim > 1) and (pred.shape[0] > 1)

    p2 = _flatten_2d(pred)
    t2 = _flatten_2d(target)
    B, D = p2.shape

    # Tiny problems are pure launch overhead for a standalone kernel; optionally let
    # XLA fuse them instead (callers may raise this threshold; 0 => always Pallas).
    if B * D < min_elements_for_pallas:
        return combined_loss_ref(pred, target, mse_weight, smooth_weight)

    itemsize = p2.dtype.itemsize
    TB = _choose_block_rows(B, D, itemsize, block_rows)
    num_tiles = (B + TB - 1) // TB

    # 2-way split over the leading "parallel" axis: sharded across the 2 TCs on
    # v7x, runs serially (same total work) on v5e/v6e.
    num_cores = 2 if num_tiles >= 2 else 1
    T2 = (num_tiles + num_cores - 1) // num_cores
    total_logical_tiles = num_cores * T2
    # Masking starts at the globally-last real tile if it's ragged; phantom tiles
    # (odd tile count) are also >= mask_start and get fully masked out.
    mask_start = num_tiles - 1 if (B % TB) != 0 else num_tiles
    needs_mask = mask_start < total_logical_tiles

    # (8, D) accumulators when the reshape-based vreg-add path is layout-clean.
    acc_rows = 8 if (TB >= 8 and TB % 8 == 0 and D % 128 == 0) else 1

    kernel = _make_loss_kernel(mse_weight, mae_weight, smooth_weight,
                               B, D, TB, T2, use_smooth, needs_mask,
                               mask_start, acc_rows)

    def in_index_map(c, i):
        # Clamp phantom tiles (odd tile count) to the last real block; their rows
        # are fully masked inside the kernel.
        return (jnp.minimum(c * T2 + i, num_tiles - 1), 0)

    # Explicit VMEM budget: 2 inputs x 2 pipeline buffers x tile + scratch + output.
    tile_bytes = TB * D * itemsize
    scratch_bytes = (3 * acc_rows + 1) * D * 4
    out_bytes = num_cores * 8 * 128 * 4
    needed = 4 * tile_bytes + scratch_bytes + 2 * out_bytes
    vmem_limit = int(min(64 * (1 << 20), max(24 * (1 << 20), int(needed * 1.3))))

    flops = (5 + (3 if use_smooth else 0)) * B * D
    bytes_accessed = 2 * B * D * itemsize + out_bytes

    out = pl.pallas_call(
        kernel,
        out_shape=jax.ShapeDtypeStruct((num_cores * 8, 128), jnp.float32),
        grid_spec=pltpu.PrefetchScalarGridSpec(
            num_scalar_prefetch=0,
            grid=(num_cores, T2),
            in_specs=[
                pl.BlockSpec((TB, D), in_index_map),
                pl.BlockSpec((TB, D), in_index_map),
            ],
            out_specs=pl.BlockSpec((8, 128), lambda c, i: (c, 0)),
            scratch_shapes=[
                pltpu.VMEM((acc_rows, D), jnp.float32),  # sum(diff^2) lane partials
                pltpu.VMEM((acc_rows, D), jnp.float32),  # sum(|diff|) lane partials
                pltpu.VMEM((acc_rows, D), jnp.float32),  # smoothness lane partials
                pltpu.VMEM((1, D), jnp.float32),         # carried last row of prev tile
            ],
        ),
        compiler_params=pltpu.CompilerParams(
            dimension_semantics=("parallel", "arbitrary"),
            vmem_limit_bytes=vmem_limit),
        cost_estimate=pl.CostEstimate(flops=flops, transcendentals=0,
                                      bytes_accessed=bytes_accessed),
    )(p2, t2)

    # Per-core weighted partials live at rows 0, 8, ... column 0.
    total = jnp.sum(out[0::8, 0])

    if use_smooth and num_cores == 2:
        # The single cross-core smoothness seam (pred[split] - pred[split-1]) is not
        # seen by either core; add it here (tiny 2-row op).
        split_row = T2 * TB
        pd = (p2[split_row].astype(jnp.float32)
              - p2[split_row - 1].astype(jnp.float32))
        inv_n_sm = 1.0 / float((B - 1) * D)
        total = total + smooth_weight * jnp.sum(pd * pd) * inv_n_sm

    return total


def combined_loss_ref(pred, target,
                      mse_weight: float = MSE_WEIGHT,
                      smooth_weight: float = SMOOTH_WEIGHT):
    """Pure-JAX reference mirroring the PyTorch module."""
    mae_weight = 1.0 - mse_weight - smooth_weight
    pred = pred.astype(jnp.float32)
    target = target.astype(jnp.float32)
    diff = pred - target
    mse = jnp.mean(diff * diff)
    mae = jnp.mean(jnp.abs(diff))
    if pred.ndim > 1 and pred.shape[0] > 1:
        pd = pred[1:] - pred[:-1]
        smooth = jnp.mean(pd * pd)
    else:
        smooth = jnp.float32(0.0)
    return mse_weight * mse + mae_weight * mae + smooth_weight * smooth


if __name__ == "__main__":
    key = jax.random.PRNGKey(0)
    k1, k2, k3, k4 = jax.random.split(key, 4)

    cases = []

    # (1) even tile count: 2-way core split, (8,D) accumulators, seam correction.
    p = jax.random.normal(k1, (64, 128), dtype=jnp.float32)
    t = jax.random.normal(k2, (64, 128), dtype=jnp.float32)
    cases.append(("f32 64x128 tile16",
                  combined_loss(p, t, block_rows=16),
                  combined_loss_ref(p, t), 1e-5, 1e-6))

    # (2) ragged last tile + non-128 feature width -> (1,D) accumulators + mask path.
    p2 = jax.random.normal(k3, (50, 96), dtype=jnp.float32)
    t2 = jax.random.normal(k4, (50, 96), dtype=jnp.float32)
    cases.append(("f32 50x96 tile16",
                  combined_loss(p2, t2, block_rows=16),
                  combined_loss_ref(p2, t2), 1e-5, 1e-6))

    # (3) odd tile count (3 tiles) -> clamped phantom tile on core 1 + ragged mask.
    p3 = jax.random.normal(k1, (40, 128), dtype=jnp.float32)
    t3 = jax.random.normal(k2, (40, 128), dtype=jnp.float32)
    cases.append(("f32 40x128 tile16",
                  combined_loss(p3, t3, block_rows=16),
                  combined_loss_ref(p3, t3), 1e-5, 1e-6))

    # (4) 3-D input: trailing dims flattened, smoothness still along dim 0.
    p4 = jax.random.normal(k3, (16, 4, 32), dtype=jnp.float32)
    t4 = jax.random.normal(k4, (16, 4, 32), dtype=jnp.float32)
    cases.append(("f32 16x4x32 tile8",
                  combined_loss(p4, t4, block_rows=8),
                  combined_loss_ref(p4, t4), 1e-5, 1e-6))

    # (5) single-row input: smoothness term statically disabled (matches PyTorch).
    cases.append(("f32 1x128",
                  combined_loss(p[:1], t[:1]),
                  combined_loss_ref(p[:1], t[:1]), 1e-5, 1e-6))

    # (6) default (auto) tile sizing -> single full-array tile, B not multiple of 8.
    p6 = jax.random.normal(k1, (10, 256), dtype=jnp.float32)
    t6 = jax.random.normal(k2, (10, 256), dtype=jnp.float32)
    cases.append(("f32 10x256 auto",
                  combined_loss(p6, t6),
                  combined_loss_ref(p6, t6), 1e-5, 1e-6))

    # (7) bf16 inputs stay bf16 through the DMA (half HBM traffic), f32 in-kernel.
    pb, tb = p.astype(jnp.bfloat16), t.astype(jnp.bfloat16)
    cases.append(("bf16 64x128 tile16",
                  combined_loss(pb, tb, block_rows=16),
                  combined_loss_ref(pb, tb), 1e-4, 1e-5))

    for name, got, want, rtol, atol in cases:
        got = jax.block_until_ready(got)
        want = jax.block_until_ready(want)
        assert jnp.allclose(got, want, rtol=rtol, atol=atol), (name, got, want)

    print("KERNEL_OK")
</pallas_src>

<mosaic_0001>
module attributes {stable_mosaic.version = 11 : i64} {
  func.func @kernel(%arg0: i32, %arg1: i32, %arg2: memref<16x128xf32, #tpu.memory_space<vmem>>, %arg3: memref<16x128xf32, #tpu.memory_space<vmem>>, %arg4: memref<8x128xf32, #tpu.memory_space<vmem>>, %arg5: memref<8x128xf32, #tpu.memory_space<vmem>>, %arg6: memref<8x128xf32, #tpu.memory_space<vmem>>, %arg7: memref<8x128xf32, #tpu.memory_space<vmem>>, %arg8: memref<1x128xf32, #tpu.memory_space<vmem>>) attributes {dimension_semantics = [#tpu.dimension_semantics<parallel>, #tpu.dimension_semantics<arbitrary>], iteration_bounds = array<i64: 2, 2>, scalar_prefetch = 0 : i64, scratch_operands = 4 : i64, tpu.core_type = #tpu.core_type<tc>, window_params = [{transform_indices = @transform_0, window_bounds = array<i64: 16, 128>}, {transform_indices = @transform_1, window_bounds = array<i64: 16, 128>}, {transform_indices = @transform_2, window_bounds = array<i64: 8, 128>}]} {
    %c0 = arith.constant 0 : index
    %c0_0 = arith.constant 0 : index
    %0 = vector.load %arg2[%c0, %c0_0] : memref<16x128xf32, #tpu.memory_space<vmem>>, vector<16x128xf32>
    %c0_1 = arith.constant 0 : index
    %c0_2 = arith.constant 0 : index
    %1 = vector.load %arg3[%c0_1, %c0_2] : memref<16x128xf32, #tpu.memory_space<vmem>>, vector<16x128xf32>
    %c0_i32 = arith.constant 0 : i32
    %2 = arith.cmpi eq, %arg1, %c0_i32 : i32
    %3 = arith.extui %2 : i1 to i32
    %c0_i32_3 = arith.constant 0 : i32
    %4 = arith.cmpi ne, %3, %c0_i32_3 : i32
    scf.if %4 {
      %cst_23 = arith.constant 0.000000e+00 : f32
      %33 = vector.broadcast %cst_23 : f32 to vector<8x128xf32>
      %c0_24 = arith.constant 0 : index
      %c0_25 = arith.constant 0 : index
      %34 = vector.load %arg5[%c0_24, %c0_25] : memref<8x128xf32, #tpu.memory_space<vmem>>, vector<8x128xf32>
      tpu.vector_store %arg5[%c0_24, %c0_25], %33 {strides = array<i32>} : memref<8x128xf32, #tpu.memory_space<vmem>>, vector<8x128xf32>,
      %cst_26 = arith.constant 0.000000e+00 : f32
      %35 = vector.broadcast %cst_26 : f32 to vector<8x128xf32>
      %c0_27 = arith.constant 0 : index
      %c0_28 = arith.constant 0 : index
      %36 = vector.load %arg6[%c0_27, %c0_28] : memref<8x128xf32, #tpu.memory_space<vmem>>, vector<8x128xf32>
      tpu.vector_store %arg6[%c0_27, %c0_28], %35 {strides = array<i32>} : memref<8x128xf32, #tpu.memory_space<vmem>>, vector<8x128xf32>,
      %cst_29 = arith.constant 0.000000e+00 : f32
      %37 = vector.broadcast %cst_29 : f32 to vector<8x128xf32>
      %c0_30 = arith.constant 0 : index
      %c0_31 = arith.constant 0 : index
      %38 = vector.load %arg7[%c0_30, %c0_31] : memref<8x128xf32, #tpu.memory_space<vmem>>, vector<8x128xf32>
      tpu.vector_store %arg7[%c0_30, %c0_31], %37 {strides = array<i32>} : memref<8x128xf32, #tpu.memory_space<vmem>>, vector<8x128xf32>,
      %39 = vector.extract_strided_slice %0 {offsets = [0, 0], sizes = [1, 128], strides = [1, 1]} : vector<16x128xf32> to vector<1x128xf32>
      %c0_32 = arith.constant 0 : index
      %c0_33 = arith.constant 0 : index
      %40 = vector.load %arg8[%c0_32, %c0_33] : memref<1x128xf32, #tpu.memory_space<vmem>>, vector<1x128xf32>
      tpu.vector_store %arg8[%c0_32, %c0_33], %39 {strides = array<i32>} : memref<1x128xf32, #tpu.memory_space<vmem>>, vector<1x128xf32>,
    } else {
    }
    %5 = arith.subf %0, %1 : vector<16x128xf32>
    %6 = arith.mulf %5, %5 : vector<16x128xf32>
    %7 = math.absf %5 : vector<16x128xf32>
    %c0_4 = arith.constant 0 : index
    %c0_5 = arith.constant 0 : index
    %8 = vector.load %arg5[%c0_4, %c0_5] : memref<8x128xf32, #tpu.memory_space<vmem>>, vector<8x128xf32>
    %9 = vector.shape_cast %6 : vector<16x128xf32> to vector<2x8x128xf32>
    %cst = arith.constant dense<0.000000e+00> : vector<8x128xf32>
    %10 = vector.multi_reduction <add>, %9, %cst [0] : vector<2x8x128xf32> to vector<8x128xf32>
    %11 = arith.addf %8, %10 : vector<8x128xf32>
    %c0_6 = arith.constant 0 : index
    %c0_7 = arith.constant 0 : index
    %12 = vector.load %arg5[%c0_6, %c0_7] : memref<8x128xf32, #tpu.memory_space<vmem>>, vector<8x128xf32>
    tpu.vector_store %arg5[%c0_6, %c0_7], %11 {strides = array<i32>} : memref<8x128xf32, #tpu.memory_space<vmem>>, vector<8x128xf32>,
    %c0_8 = arith.constant 0 : index
    %c0_9 = arith.constant 0 : index
    %13 = vector.load %arg6[%c0_8, %c0_9] : memref<8x128xf32, #tpu.memory_space<vmem>>, vector<8x128xf32>
    %14 = vector.shape_cast %7 : vector<16x128xf32> to vector<2x8x128xf32>
    %cst_10 = arith.constant dense<0.000000e+00> : vector<8x128xf32>
    %15 = vector.multi_reduction <add>, %14, %cst_10 [0] : vector<2x8x128xf32> to vector<8x128xf32>
    %16 = arith.addf %13, %15 : vector<8x128xf32>
    %c0_11 = arith.constant 0 : index
    %c0_12 = arith.constant 0 : index
    %17 = vector.load %arg6[%c0_11, %c0_12] : memref<8x128xf32, #tpu.memory_space<vmem>>, vector<8x128xf32>
    tpu.vector_store %arg6[%c0_11, %c0_12], %16 {strides = array<i32>} : memref<8x128xf32, #tpu.memory_space<vmem>>, vector<8x128xf32>,
    %c0_13 = arith.constant 0 : index
    %c0_14 = arith.constant 0 : index
    %18 = vector.load %arg8[%c0_13, %c0_14] : memref<1x128xf32, #tpu.memory_space<vmem>>, vector<1x128xf32>
    %19 = vector.extract_strided_slice %0 {offsets = [0, 0], sizes = [15, 128], strides = [1, 1]} : vector<16x128xf32> to vector<15x128xf32>
    %20 = tpu.concatenate %18, %19 in 0 : vector<1x128xf32>, vector<15x128xf32> -> vector<16x128xf32>
    %21 = arith.subf %0, %20 : vector<16x128xf32>
    %22 = arith.mulf %21, %21 : vector<16x128xf32>
    %c0_15 = arith.constant 0 : index
    %c0_16 = arith.constant 0 : index
    %23 = vector.load %arg7[%c0_15, %c0_16] : memref<8x128xf32, #tpu.memory_space<vmem>>, vector<8x128xf32>
    %24 = vector.shape_cast %22 : vector<16x128xf32> to vector<2x8x128xf32>
    %cst_17 = arith.constant dense<0.000000e+00> : vector<8x128xf32>
    %25 = vector.multi_reduction <add>, %24, %cst_17 [0] : vector<2x8x128xf32> to vector<8x128xf32>
    %26 = arith.addf %23, %25 : vector<8x128xf32>
    %c0_18 = arith.constant 0 : index
    %c0_19 = arith.constant 0 : index
    %27 = vector.load %arg7[%c0_18, %c0_19] : memref<8x128xf32, #tpu.memory_space<vmem>>, vector<8x128xf32>
    tpu.vector_store %arg7[%c0_18, %c0_19], %26 {strides = array<i32>} : memref<8x128xf32, #tpu.memory_space<vmem>>, vector<8x128xf32>,
    %28 = vector.extract_strided_slice %0 {offsets = [15, 0], sizes = [1, 128], strides = [1, 1]} : vector<16x128xf32> to vector<1x128xf32>
    %c0_20 = arith.constant 0 : index
    %c0_21 = arith.constant 0 : index
    %29 = vector.load %arg8[%c0_20, %c0_21] : memref<1x128xf32, #tpu.memory_space<vmem>>, vector<1x128xf32>
    tpu.vector_store %arg8[%c0_20, %c0_21], %28 {strides = array<i32>} : memref<1x128xf32, #tpu.memory_space<vmem>>, vector<1x128xf32>,
    %c1_i32 = arith.constant 1 : i32
    %30 = arith.cmpi eq, %arg1, %c1_i32 : i32
    %31 = arith.extui %30 : i1 to i32
    %c0_i32_22 = arith.constant 0 : i32
    %32 = arith.cmpi ne, %31, %c0_i32_22 : i32
    scf.if %32 {
      %c0_23 = arith.constant 0 : index
      %c0_24 = arith.constant 0 : index
      %33 = vector.load %arg5[%c0_23, %c0_24] : memref<8x128xf32, #tpu.memory_space<vmem>>, vector<8x128xf32>
      %34 = vector.shape_cast %33 : vector<8x128xf32> to vector<1x8x128xf32>
      %cst_25 = arith.constant dense<0.000000e+00> : vector<1xf32>
      %35 = vector.multi_reduction <add>, %34, %cst_25 [1, 2] : vector<1x8x128xf32> to vector<1xf32>
      %36 = vector.shape_cast %35 : vector<1xf32> to vector<1x1x1xf32>
      %37 = vector.extract %36[0, 0, 0] : f32 from vector<1x1x1xf32>
      %cst_26 = arith.constant 8.000000e-01 : f32
      %38 = arith.mulf %cst_26, %37 : f32
      %c0_27 = arith.constant 0 : index
      %c0_28 = arith.constant 0 : index
      %39 = vector.load %arg6[%c0_27, %c0_28] : memref<8x128xf32, #tpu.memory_space<vmem>>, vector<8x128xf32>
      %40 = vector.shape_cast %39 : vector<8x128xf32> to vector<1x8x128xf32>
      %cst_29 = arith.constant dense<0.000000e+00> : vector<1xf32>
      %41 = vector.multi_reduction <add>, %40, %cst_29 [1, 2] : vector<1x8x128xf32> to vector<1xf32>
      %42 = vector.shape_cast %41 : vector<1xf32> to vector<1x1x1xf32>
      %43 = vector.extract %42[0, 0, 0] : f32 from vector<1x1x1xf32>
      %cst_30 = arith.constant 1.000000e-01 : f32
      %44 = arith.mulf %cst_30, %43 : f32
      %45 = arith.addf %38, %44 : f32
      %cst_31 = arith.constant 1.22070313E-4 : f32
      %46 = arith.mulf %45, %cst_31 : f32
      %c0_32 = arith.constant 0 : index
      %c0_33 = arith.constant 0 : index
      %47 = vector.load %arg7[%c0_32, %c0_33] : memref<8x128xf32, #tpu.memory_space<vmem>>, vector<8x128xf32>
      %48 = vector.shape_cast %47 : vector<8x128xf32> to vector<1x8x128xf32>
      %cst_34 = arith.constant dense<0.000000e+00> : vector<1xf32>
      %49 = vector.multi_reduction <add>, %48, %cst_34 [1, 2] : vector<1x8x128xf32> to vector<1xf32>
      %50 = vector.shape_cast %49 : vector<1xf32> to vector<1x1x1xf32>
      %51 = vector.extract %50[0, 0, 0] : f32 from vector<1x1x1xf32>
      %cst_35 = arith.constant 1.000000e-01 : f32
      %52 = arith.mulf %cst_35, %51 : f32
      %cst_36 = arith.constant 1.24007944E-4 : f32
      %53 = arith.mulf %52, %cst_36 : f32
      %54 = arith.addf %46, %53 : f32
      %55 = vector.broadcast %54 : f32 to vector<8x128xf32>
      %c0_37 = arith.constant 0 : index
      %c0_38 = arith.constant 0 : index
      %56 = vector.load %arg4[%c0_37, %c0_38] : memref<8x128xf32, #tpu.memory_space<vmem>>, vector<8x128xf32>
      tpu.vector_store %arg4[%c0_37, %c0_38], %55 {strides = array<i32>} : memref<8x128xf32, #tpu.memory_space<vmem>>, vector<8x128xf32>,
    } else {
    }
    return
  }
  func.func @transform_0(%arg0: i32, %arg1: i32) -> (i32, i32) {
    %c2_i32 = arith.constant 2 : i32
    %0 = arith.muli %arg0, %c2_i32 : i32
    %1 = arith.addi %0, %arg1 : i32
    %c3_i32 = arith.constant 3 : i32
    %2 = arith.minsi %1, %c3_i32 : i32
    %c0_i32 = arith.constant 0 : i32
    %c0_i32_0 = arith.constant 0 : i32
    return %2, %c0_i32 : i32, i32
  }
  func.func @transform_1(%arg0: i32, %arg1: i32) -> (i32, i32) {
    %c2_i32 = arith.constant 2 : i32
    %0 = arith.muli %arg0, %c2_i32 : i32
    %1 = arith.addi %0, %arg1 : i32
    %c3_i32 = arith.constant 3 : i32
    %2 = arith.minsi %1, %c3_i32 : i32
    %c0_i32 = arith.constant 0 : i32
    %c0_i32_0 = arith.constant 0 : i32
    return %2, %c0_i32 : i32, i32
  }
  func.func @transform_2(%arg0: i32, %arg1: i32) -> (i32, i32) {
    %c0_i32 = arith.constant 0 : i32
    %c0_i32_0 = arith.constant 0 : i32
    return %arg0, %c0_i32 : i32, i32
  }
}

</mosaic_0001>

<bundles_post_ra>
// kernel: tpu_custom_call.1
= control target key start
LH: loop header
LB: loop body
LE: loop exit
PB: predicated region body
PF: predicated region fallthrough
CT: control target
= control target key end

     0   :  { %s1104_s0 = inlined_call_operand.hbm [shape: f32[64,128], index: 0, kind: input, shape index: {}]   ;;  %s1105_s1 = inlined_call_operand.hbm [shape: f32[64,128], index: 1, kind: input, shape index: {}]   ;;  %s1106_s2 = inlined_call_operand.hbm [shape: f32[16,128], index: 2, kind: output, shape index: {}]  }
   0x1   :  { %1115 = sst [smem:[#allocation19_spill]] %s1104_s0 }
   0x2   :  { %7 = vsyncpa [#allocation7], 0 }
   0x3   :  { %9 = vsyncpa [#allocation7 + $0x1], 0 }
   0x4   :  { %10 = vsyncpa [#allocation10], 0 }
   0x5   :  { %12 = vsyncpa [#allocation10 + $0x1], 0 }
   0x6   :  { %13 = vsyncpa [#allocation8], 0 }
   0x7   :  { %15 = vsyncpa [#allocation8 + $0x1], 0  ;;  %s807_s9 = smov 0   ;;  %s809_s10 = smov 0  }
   0x8   :  { %s811_s11 = smov 0   ;;  %s813_s12 = smov 0  }
   0x9   :  { %s815_s13 = smov 0   ;;  %s817_s14 = smov 0  }
   0xa   :  { %s819_s15 = smov 0   ;;  %s821_s16 = smov 0  }
   0xb   :  { %s823_s17 = smov 0   ;;  %s825_s18 = smov 0  }
   0xc   :  { %s827_s19 = smov 0  }
   0xd LB: > { %1116 = sst [smem:[#allocation15_spill]] %s776_s17  ;;  %s454_s20 = sadd.s32 4294967295, %s784_s19   ;;  %s784_s19 = sphi %s827_s19, %s21_s19   ;;  %s780_s18 = sphi %s825_s18, %s1136_s18   ;;  %s776_s17 = sphi %s823_s17, %s1135_s17   ;;  %s772_s16 = sphi %s821_s16, %s1134_s16   ;;  %s768_s15 = sphi %s819_s15, %s1133_s15   ;;  %s764_s14 = sphi %s817_s14, %s1142_s14   ;;  %s760_s13 = sphi %s815_s13, %s1141_s13   ;;  %s756_s12 = sphi %s813_s12, %s1140_s12   ;;  %s752_s11 = sphi %s811_s11, %s1139_s11   ;;  %s748_s10 = sphi %s809_s10, %s1138_s10   ;;  %s744_s9 = sphi %s807_s9, %s1137_s9  }
   0xe   : > { %1117 = sst [smem:[#allocation16_spill]] %s780_s18  ;;  %s455_s21 = sadd.s32 4294967294, %s784_s19  }
   0xf   : > { %s30_s22 = sadd.s32 1, %s776_s17  ;;  %s33_s23 = sadd.s32 1, %s780_s18 }
  0x10   : > { %p31_p0 = scmp.ge.s32.totalorder %s30_s22, 2  ;;  %s456_s24 = sshll.u32 %s780_s18, 1 }
  0x11   : > { %s38_s25 = sadd.s32 %s776_s17, %s456_s24  ;;  %s48_s26 = sadd.s32 1, %s764_s14 }
  0x12   : > { %s1144_s22 = smov (%p31_p0, %s30_s22), 0  ;;  %s1146_s23 = smov (!%p31_p0, %s33_s23), %s780_s18 }
  0x13   : > { %1118 = sst [smem:[#allocation17_spill]] %s1144_s22  ;;  %p39_p1 = scmp.lt.s32.totalorder %s38_s25, 3 }
  0x14   : > { %p55_p2 = scmp.ne.s32.totalorder %s764_s14, %s760_s13  ;;  %p35_p3 = scmp.ge.s32.totalorder %s1146_s23, 2 }
  0x15   : > { %p56_p4 = scmp.eq.s32.totalorder %s784_s19, 0  ;;  %s1148_s25 = smov (!%p39_p1, %s38_s25), 3 }
  0x16   : > { %s1150_s23 = smov (%p35_p3, %s1146_s23), 0  ;;  %p61_p6 = scmp.ne.s32.totalorder %s760_s13, %s756_s12 }
  0x17   : > { %1119 = sst [smem:[#allocation18_spill]] %s1150_s23  ;;  %p879_p5 = por %p56_p4, %p55_p2 }
  0x18   : > { %s457_s28 = sshll.u32 %s1150_s23, 1  ;;  %p62_p7 = scmp.eq.s32.totalorder %s454_s20, 0 }
  0x19   : > { %s42_s29 = sadd.s32 %s457_s28, %s1144_s22  ;;  %s105_s30 = ssub.s32 %s780_s18, %s1150_s23 }
  0x1a   : > { %p43_p8 = scmp.lt.s32.totalorder %s42_s29, 3  ;;  %p891_p9 = por %p62_p7, %p61_p6 }
  0x1b   : > { %p106_p10 = scmp.eq.s32.totalorder %s105_s30, 0  ;;  %s108_s4 = sadd.s32 1, %s752_s11 }
  0x1c   : > { %s1121_s3 = scalar_select %p891_p9, 1, 0 }
  0x1d   : > { %s1152_s29 = smov (!%p43_p8, %s42_s29), 3  ;;  %p118_p11 = scmp.ne.s32.totalorder %s752_s11, %s748_s10 }
  0x1e   : > { %s897_s5 = scalar_select %p106_p10, %s752_s11, %s108_s4  }
  0x1f   : > { %s45_s6 = ssub.s32 %s1148_s25, %s1152_s29  ;;  %p119_p13 = scmp.eq.s32.totalorder %s454_s20, 3 }
  0x20   : > { %p46_p12 = scmp.eq.s32.totalorder %s45_s6, 0  ;;  %p124_p0 = scmp.ne.s32.totalorder %s748_s10, %s744_s9 }
  0x21   : > { %p125_p1 = scmp.eq.s32.totalorder %s455_s21, 3  ;;  %p911_p2 = por %p119_p13, %p118_p11 }
  0x22   : > { %s909_s7 = scalar_select %p46_p12, %s764_s14, %s48_s26  }
  0x23   : > { %s1122_s8 = scalar_select %p911_p2, 1, 0 }
  0x24   : > { %p915_p3 = por %p125_p1, %p124_p0  ;;  %p505_p4 = scmp.lt.s32.totalorder %s784_s19, 4 }
  0x25   : > { %s921_s24 = sand.u32 1, %s764_s14   ;;  %s1109_s20 = sshll.u32 %s1148_s25, 8 }
  0x26   : > { %s1123_s12 = scalar_select %p915_p3, 1, 0 }
  0x27   : > { %s1108_s28 = sshll.u32 %s921_s24, 4  ;;  %s1124_s0 = sld [smem:[#allocation19_spill]] }
  0x28   : > { %s149_s30 = scalar_lea.vmem [#allocation6], %s1108_s28  ;;  %p936_p6 = pnand %p505_p4, %p879_p5 }
  0x29   : > { %s160_s4 = sshll.u32 %s149_s30, 4  ;;  %s940_s4 = int_to_ptr.vmem [resolvable:$true] %s160_s4 }
  0x2a   : > { %p600_p8 = pneg %p936_p6 }
  0x2d   : > { %s930_s29 = scalar_lea.hbm %s1124_s0, %s1109_s20  ;;  %s603_s27 = scalar_lea.hbm %s1124_s0, 1024 }
  0x2e   : > { %s598_s21 = scalar_lea.hbm %s930_s29, 256  ;;  %p604_p5 = scmp.lt.u32.totalorder %s930_s29, %s1124_s0 }
  0x2f   : > { %p599_p7 = scmp.ne.s32.totalorder %s930_s29, %s598_s21  ;;  %p605_p12 = scmp.lt.u32.totalorder %s603_s27, %s598_s21 }
  0x30   : > { %p607_p0 = scmp.lt.u32.totalorder %s598_s21, %s930_s29 }
  0x31   : > { %p601_p10 = pnand %p600_p8, %p599_p7  ;;  %p606_p13 = por %p605_p12, %p604_p5 }
  0x33   : > { %p602_p11 = pneg %p601_p10  ;;  %p608_p1 = por %p607_p0, %p606_p13 }
  0x35   : > { %p609_p4 = pnand %p608_p1, %p602_p11 }
  0x37   : > { %612 = shalt.err (!%p609_p4)
}
  0x38   : > { %s613_s23 = scalar_lea.vmem %s940_s4, 256  ;;  %s786_s26 = smov [#allocation6]  }
  0x39   : > { %p614_p7 = scmp.ne.s32.totalorder %s940_s4, %s613_s23  ;;  %s618_s30 = sshll.u32 %s786_s26, 4  ;;  %s619_s30 = int_to_ptr.vmem [resolvable:$false] %s618_s30 }
  0x3a   : > { %s620_s20 = scalar_lea.vmem %s619_s30, 512  ;;  %p621_p2 = scmp.lt.s32.totalorder %s940_s4, %s619_s30 }
  0x3b   : > { %p616_p10 = pnand %p614_p7, %p600_p8  ;;  %p622_p5 = scmp.lt.s32.totalorder %s620_s20, %s613_s23 }
  0x3d   : > { %p617_p3 = pneg %p616_p10  ;;  %p623_p12 = por %p622_p5, %p621_p2 }
  0x3f   : > { %p624_p13 = pnand %p623_p12, %p617_p3 }
  0x41   : > { %627 = shalt.err (!%p624_p13)
}
  0x42   : > { %s787_s28 = smov 128   ;;  %s788_s21 = smov 8  }
  0x43   : > { %s1126_s23 = scalar_lea.sflag [#allocation7], %s921_s24  ;;  %p470_p2 = scmp.ge.s32.totalorder %s784_s19, 1 }
  0x44   : > { %497 = dma.hbm_to_vmem [thread:$0]  (!%p936_p6), %s930_s29, 256, %s940_s4, %s1126_s23, %s787_s28, %s787_s28, %s788_s21  }
  0x45   : > { %p193_p3 = scmp.lt.s32.totalorder %s784_s19, 5  ;;  %s1128_s26 = sshll.u32 %s1148_s25, 8 }
  0x46   : > { %s984_s0 = scalar_lea.hbm %s1105_s1, %s1128_s26  ;;  %s1129_s22 = sshll.u32 %s921_s24, 4 }
  0x47   : > { %p975_p11 = pnand %p470_p2, %p193_p3  ;;  %s174_s18 = scalar_lea.vmem [#allocation9], %s1129_s22 }
  0x48   : > { %s185_s17 = sshll.u32 %s174_s18, 4  ;;  %s171_s29 = scalar_lea.sflag [#allocation10], %s921_s24  ;;  %s988_s17 = int_to_ptr.vmem [resolvable:$true] %s185_s17 }
  0x49   : > { %s628_s4 = scalar_lea.hbm %s984_s0, 256  ;;  %s633_s26 = scalar_lea.hbm %s1105_s1, 1024 }
  0x4a   : > { %p629_p0 = scmp.ne.s32.totalorder %s984_s0, %s628_s4  ;;  %p634_p7 = scmp.lt.u32.totalorder %s984_s0, %s1105_s1 }
  0x4b   : > { %p635_p10 = scmp.lt.u32.totalorder %s633_s26, %s628_s4  ;;  %p637_p12 = scmp.lt.u32.totalorder %s628_s4, %s984_s0 }
  0x4c   : > { %p631_p1 = pnand %p629_p0, %p600_p8 }
  0x4d   : > { %p636_p5 = por %p635_p10, %p634_p7 }
  0x4e   : > { %p632_p4 = pneg %p631_p1 }
  0x4f   : > { %p638_p13 = por %p637_p12, %p636_p5 }
  0x51   : > { %p639_p2 = pnand %p638_p13, %p632_p4 }
  0x53   : > { %642 = shalt.err (!%p639_p2)
}
  0x54   : > { %s643_s18 = scalar_lea.vmem %s988_s17, 256  ;;  %s789_s22 = smov [#allocation9]  }
  0x55   : > { %p644_p3 = scmp.ne.s32.totalorder %s988_s17, %s643_s18  ;;  %s648_s25 = sshll.u32 %s789_s22, 4  ;;  %s649_s25 = int_to_ptr.vmem [resolvable:$false] %s648_s25 }
  0x56   : > { %s650_s23 = scalar_lea.vmem %s649_s25, 512  ;;  %p651_p9 = scmp.lt.s32.totalorder %s988_s17, %s649_s25 }
  0x57   : > { %p646_p0 = pnand %p644_p3, %p600_p8  ;;  %p652_p7 = scmp.lt.s32.totalorder %s650_s23, %s643_s18 }
  0x59   : > { %p647_p1 = pneg %p646_p0  ;;  %p653_p10 = por %p652_p7, %p651_p9 }
  0x5b   : > { %p654_p5 = pnand %p653_p10, %p647_p1 }
  0x5d   : > { %657 = shalt.err (!%p654_p5)
}
  0x5e   : > { %500 = dma.hbm_to_vmem [thread:$0]  (!%p936_p6), %s984_s0, 256, %s988_s17, %s171_s29, %s787_s28, %s787_s28, %s788_s21  }
  0x5f   : > { %197 = sbr.rel (%p975_p11) target bundleno = 373 (0x175), region = 28  ;;  %s199_s4 = sand.u32 (!%p975_p11), 1, %s760_s13  }
  0x60   : > { %s471_s26 = sshll.u32 (!%p975_p11), %s199_s4, 4  ;;  %s200_s30 = scalar_lea.sflag (!%p975_p11), [#allocation7], %s199_s4 }
  0x61   : > { %s203_s20 = scalar_lea.vmem (!%p975_p11), [#allocation6], %s471_s26  ;;  %p1130_p9 = scmp.ne.s32.totalorder (!%p975_p11), %s1121_s3, 0 }
  0x66   : > { %731 = dma.done.wait (%p1130_p9), %s200_s30, 256  }
  0x67   : > { %733 = vsyncadd (%p1130_p9), %s200_s30, 4294967040  ;;  %s209_s6 = scalar_lea.sflag [#allocation10], %s199_s4  ;;  %s212_s24 = scalar_lea.vmem [#allocation9], %s471_s26 }
  0x68   : > { %735 = dma.done.wait (%p1130_p9), %s209_s6, 256  }
  0x69   : > { %737 = vsyncadd (%p1130_p9), %s209_s6, 4294967040  ;;  %s235_s0 = sand.u32 1, %s748_s10   ;;  %v248_v0 = vld [vmem:[%s203_s20] sm:$0xff]  ;;  %v249_v1 = vld [vmem:[%s203_s20 + $0x8] sm:$0xff]  ;;  %p474_p6 = scmp.ne.s32.totalorder %s768_s15, 0 }
  0x6a   : > { %s1033_s17 = sshll.u32 %s235_s0, 3  ;;  %v250_v2 = vld [vmem:[%s212_s24] sm:$0xff]  ;;  %v251_v3 = vld [vmem:[%s212_s24 + $0x8] sm:$0xff]  ;;  %259 = vst [vmem:[#allocation5] sm:$0x1] (!%p474_p6), %v248_v0  ;;  %v790_v4 = vmov (!%p474_p6), 0.0  }
  0x6b   : > { %s237_s28 = scalar_lea.vmem [#allocation11], %s1033_s17  ;;  %255 = sbr.rel (%p474_p6) target bundleno = 114 (0x72), region = 40  ;;  %256 = vst [vmem:[#allocation2] sm:$0xff] (!%p474_p6), %v790_v4  ;;  %257 = vst [vmem:[#allocation3] sm:$0xff] (!%p474_p6), %v790_v4 }
  0x6c   : > { %258 = vst [vmem:[#allocation4] sm:$0xff] (!%p474_p6), %v790_v4 }
  0x72 PF: > { %v260_v5 = vsub.f32 %v248_v0, %v250_v2  ;;  %v261_v6 = vsub.f32 %v249_v1, %v251_v3  ;;  %v274_v7 = vld [vmem:[#allocation5] sm:$0x1]  ;;  %vm277_vm0 = vcmask 1040384   ;;  %v278_v8 = vrot.slane %v248_v0, 7  ;;  %v266_v14 = vld [vmem:[#allocation2] sm:$0xff]  ;;  %v270_v15 = vld [vmem:[#allocation3] sm:$0xff] }
  0x73   : > { %v279_v9 = vrot.slane %v249_v1, 7  ;;  %292 = vst [vmem:[#allocation5 - $0x7] sm:$0x80] %v249_v1  ;;  %v288_v26 = vld [vmem:[#allocation4] sm:$0xff]  ;;  %p475_p8 = scmp.ne.s32.totalorder %s768_s15, 1 }
  0x74   : > { %v262_v10 = vmul.f32 %v260_v5, %v260_v5  ;;  %v263_v11 = vmul.f32 %v261_v6, %v261_v6  ;;  %v264_v12 = vand.u32 2147483647, %v260_v5  ;;  %v265_v13 = vand.u32 2147483647, %v261_v6 }
  0x75   : > { %v280_v16 = vsel %vm277_vm0, %v278_v8, %v279_v9  ;;  %v283_v17 = vsel %vm277_vm0, %v274_v7, %v278_v8 }
  0x76   : > { %v267_v18 = vadd.f32 %v263_v11, %v262_v10  ;;  %v271_v19 = vadd.f32 %v265_v13, %v264_v12  ;;  %v284_v20 = vsub.f32 %v248_v0, %v283_v17  ;;  %v285_v21 = vsub.f32 %v249_v1, %v280_v16 }
  0x78   : > { %v268_v22 = vadd.f32 %v267_v18, %v266_v14  ;;  %v272_v23 = vadd.f32 %v271_v19, %v270_v15  ;;  %v286_v24 = vmul.f32 %v284_v20, %v284_v20  ;;  %v287_v25 = vmul.f32 %v285_v21, %v285_v21  ;;  %296 = sbr.rel (%p475_p8) target bundleno = 348 (0x15c), region = 44 }
  0x7a   : > { %269 = vst [vmem:[#allocation2] sm:$0xff] %v268_v22  ;;  %273 = vst [vmem:[#allocation3] sm:$0xff] %v272_v23  ;;  %v289_v27 = vadd.f32 %v287_v25, %v286_v24 }
  0x7c   : > { %v290_v28 = vadd.f32 %v289_v27, %v288_v26 }
  0x7e   : > { %291 = vst [vmem:[#allocation4] sm:$0xff] %v290_v28 }
  0x81   : > { %v297_v30 = vld [vmem:[#allocation2] sm:$0xff]  ;;  %v308_v31 = vld [vmem:[#allocation3] sm:$0xff] }
  0x82   : > { %298 = vadd.xlane.f32.xlu0 %v297_v30 }
  0x85   : > { %v321_v29 = vld [vmem:[#allocation4] sm:$0xff] }
  0x86   : > { %322 = vadd.xlane.f32.xlu1 %v321_v29  ;;  %309 = vadd.xlane.f32.xlu0 %v308_v31 }
 0x10f   : > { %v299_v33 = vpop.xlane.xlu0 %298 }
 0x110   : > { %v300_v35 = vrot.slane %v299_v33, 4 }
 0x112   : > { %v301_v37 = vadd.f32 %v300_v35, %v299_v33 }
 0x113   : > { %v323_v32 = vpop.xlane.xlu1 %322  ;;  %v310_v38 = vpop.xlane.xlu0 %309 }
 0x114   : > { %v324_v34 = vrot.slane %v323_v32, 4  ;;  %v302_v40 = vrot.slane %v301_v37, 2  ;;  %v311_v41 = vrot.slane %v310_v38, 4 }
 0x116   : > { %v325_v36 = vadd.f32 %v324_v34, %v323_v32  ;;  %v312_v42 = vadd.f32 %v311_v41, %v310_v38  ;;  %v303_v43 = vadd.f32 %v302_v40, %v301_v37 }
 0x118   : > { %v326_v39 = vrot.slane %v325_v36, 2  ;;  %v313_v45 = vrot.slane %v312_v42, 2  ;;  %v304_v46 = vrot.slane %v303_v43, 1 }
 0x11a   : > { %v327_v44 = vadd.f32 %v326_v39, %v325_v36  ;;  %v314_v47 = vadd.f32 %v313_v45, %v312_v42  ;;  %v305_v48 = vadd.f32 %v304_v46, %v303_v43 }
 0x11c   : > { %v328_v49 = vrot.slane %v327_v44, 1  ;;  %482 = vpush %v305_v48  ;;  %v315_v50 = vrot.slane %v314_v47, 1 }
 0x11e   : > { %v316_v51 = vadd.f32 %v315_v50, %v314_v47  ;;  %v329_v52 = vadd.f32 %v328_v49, %v327_v44 }
 0x120   : > { %484 = vpush %v316_v51 }
 0x121   : > { %486 = vpush %v329_v52 }
 0x14d   : > { %s483_s15 = spop %482 }
 0x14e   : > { %s307_s3 = smul.f32 0.8, %s483_s15 }
 0x151   : > { %s485_s21 = spop %484 }
 0x152   : > { %s318_s27 = smul.f32 0.1, %s485_s21  ;;  %s487_s29 = spop %486 }
 0x153   : > { %s331_s18 = smul.f32 0.1, %s487_s29 }
 0x154   : > { %s319_s22 = sadd.f32 %s318_s27, %s307_s3 }
 0x155   : > { %s332_s25 = smul.f32 0.00012400794, %s331_s18 }
 0x156   : > { %s320_s23 = smul.f32 0.00012207031, %s319_s22 }
 0x158   : > { %s333_s4 = sadd.f32 %s332_s25, %s320_s23 }
 0x15a   : > { %v334_v53 = vstv %s333_s4 }
 0x15b   : > { %335 = vst [vmem:[%s237_s28] sm:$0xff] %v334_v53 }
 0x15c PF: > { %s477_s26 = sshll.u32 %s772_s16, 7  ;;  %s350_s24 = sshll.u32 %s237_s28, 4  ;;  %s351_s24 = int_to_ptr.vmem [resolvable:$true] %s350_s24 }
 0x15d   : > { %s1044_s6 = scalar_lea.hbm %s1106_s2, %s477_s26  ;;  %s337_s15 = scalar_lea.sflag [#allocation8], %s235_s0 }
 0x15e   : > { %s658_s3 = scalar_lea.vmem %s351_s24, 128  ;;  %p1131_p4 = scmp.ne.s32.totalorder %s1122_s8, 0 }
 0x15f   : > { %p659_p11 = scmp.ne.s32.totalorder %s351_s24, %s658_s3  ;;  %s791_s21 = smov [#allocation11]  }
 0x160   : > { %s662_s27 = sshll.u32 %s791_s21, 4  ;;  %s663_s27 = int_to_ptr.vmem [resolvable:$false] %s662_s27 }
 0x161   : > { %p660_p12 = pnand %p659_p11, %p1131_p4  ;;  %s664_s29 = scalar_lea.vmem %s663_s27, 256 }
 0x162   : > { %p665_p2 = scmp.lt.s32.totalorder %s351_s24, %s663_s27  ;;  %p666_p3 = scmp.lt.s32.totalorder %s664_s29, %s658_s3 }
 0x163   : > { %p661_p13 = pneg %p660_p12 }
 0x164   : > { %p667_p0 = por %p666_p3, %p665_p2 }
 0x166   : > { %p668_p1 = pnand %p667_p0, %p661_p13 }
 0x168   : > { %671 = shalt.err (!%p668_p1)
}
 0x169   : > { %s672_s16 = scalar_lea.hbm %s1044_s6, 128  ;;  %s676_s28 = scalar_lea.hbm %s1106_s2, 256 }
 0x16a   : > { %p673_p7 = scmp.ne.s32.totalorder %s1044_s6, %s672_s16  ;;  %p677_p9 = scmp.lt.u32.totalorder %s1044_s6, %s1106_s2 }
 0x16b   : > { %p678_p6 = scmp.lt.u32.totalorder %s676_s28, %s672_s16  ;;  %p680_p11 = scmp.lt.u32.totalorder %s672_s16, %s1044_s6 }
 0x16c   : > { %p674_p10 = pnand %p673_p7, %p1131_p4 }
 0x16d   : > { %p679_p8 = por %p678_p6, %p677_p9 }
 0x16e   : > { %p675_p5 = pneg %p674_p10 }
 0x16f   : > { %p681_p12 = por %p680_p11, %p679_p8 }
 0x171   : > { %p682_p13 = pnand %p681_p12, %p675_p5 }
 0x173   : > { %685 = shalt.err (!%p682_p13)
}
 0x174   : > { %492 = dma.vmem_to_hbm [thread:$0]  (%p1131_p4), %s351_s24, 128, %s1044_s6, %s337_s15  }
 0x175 PF: > { %p506_p2 = scmp.ge.s32.totalorder %s784_s19, 2  ;;  %s362_s25 = sand.u32 1, %s744_s9  }
 0x176   : > { %p1132_p3 = scmp.ne.s32.totalorder %s1123_s12, 0  ;;  %s363_s23 = scalar_lea.sflag [#allocation8], %s362_s25 }
 0x178   : > { %p502_p0 = pnand %p506_p2, %p1132_p3 }
 0x17a   : > { %739 = dma.done.wait (!%p502_p0), %s363_s23, 128  }
 0x17b   : > { %741 = vsyncadd (!%p502_p0), %s363_s23, 4294967168  ;;  %s21_s19 = sadd.s32 1, %s784_s19   ;;  %s1133_s15 = sld [smem:[#allocation15_spill]] }
 0x17c   : > { %p18_p1 = scmp.ge.s32.totalorder %s21_s19, 6   ;;  %s1134_s16 = sld [smem:[#allocation16_spill]] }
 0x17d   : > { %s1135_s17 = sld [smem:[#allocation17_spill]]  ;;  %s1136_s18 = sld [smem:[#allocation18_spill]] }
 0x17e   : > { %s1137_s9 = smov %s748_s10  ;;  %s1138_s10 = smov %s752_s11 }
 0x17f   : > { %s1139_s11 = smov %s897_s5  ;;  %s1140_s12 = smov %s760_s13 }
 0x180   : > { %s1141_s13 = smov %s764_s14  ;;  %s1142_s14 = smov %s909_s7 }
 0x181   :  { %20 = sbr.rel (!%p18_p1) target bundleno = 13 (0xd), region = 94 }
 0x188   :  { %368 = vsyncpa [#allocation7], 1 }
 0x189   :  { %370 = vsyncpa [#allocation7 + $0x1], 1 }
 0x18a   :  { %371 = vsyncpa [#allocation10], 1 }
 0x18b   :  { %373 = vsyncpa [#allocation10 + $0x1], 1 }
 0x18c   :  { %374 = vsyncpa [#allocation8], 1 }
 0x18d   :  { %376 = vsyncpa [#allocation8 + $0x1], 1 }

</bundles_post_ra>
